<compile_context>
chip_gen: v5e
topology: v5e:2x2
jax: 0.10.0
libtpu: 0.0.40
codegen_flags: <defaults>
</compile_context>

<pallas_src>
import math

import jax
import jax.numpy as jnp
from jax.experimental import pallas as pl
from jax.experimental.pallas import tpu as pltpu

_LANES = 128                      # TPU vreg lane width; block spans full width
_TARGET_BLOCK_BYTES = 4 << 20     # ~4 MiB per block (f32 & bf16 alike)
_VMEM_LIMIT_BYTES = 32 << 20      # 2 arrays x 2 buffers x 4 MiB = 16 MiB used
_MIN_KERNEL_ELEMENTS = 1 << 16    # below this, plain XLA is strictly faster
_SUBLANE_BY_ITEMSIZE = {4: 8, 2: 16, 1: 32}


def _scale_kernel(scale_ref, x_ref, o_ref):
    # scale_ref: (1,) f32 in SMEM; x_ref/o_ref: (block_rows, 128) VMEM blocks.
    # Single VPU multiply per vreg; the splat of the scalar is free in VALU.
    o_ref[...] = x_ref[...] * scale_ref[0].astype(x_ref.dtype)


def uniform_box_warp(coordinates: jax.Array, sidelength: float) -> jax.Array:
    """Pallas equivalent of UniformBoxWarp(sidelength)(coordinates)."""
    orig_shape = coordinates.shape
    dtype = coordinates.dtype
    total = math.prod(orig_shape)
    scale_py = 2.0 / float(sidelength)

    # ---- fast path / fallback ---------------------------------------------
    # Tiny inputs: launch overhead dominates.  Lane-ragged totals: handling
    # them in Pallas would need a pad or a prefix slice + concat, each a full
    # extra HBM round trip; a fused XLA multiply is already at roofline.
    if total < _MIN_KERNEL_ELEMENTS or total % _LANES != 0:
        return coordinates * jnp.asarray(scale_py, dtype=dtype)

    # ---- zero-copy lane-dense 2D view --------------------------------------
    rows = total // _LANES
    itemsize = jnp.dtype(dtype).itemsize
    sub = _SUBLANE_BY_ITEMSIZE.get(itemsize, 8)

    # Target ~4 MiB blocks; force >= 2 blocks so v7x can use both TensorCores.
    block_rows = max(sub, _TARGET_BLOCK_BYTES // (_LANES * itemsize))
    if block_rows >= rows:
        block_rows = pl.cdiv(rows, 2)
    block_rows = max(sub, (min(block_rows, rows) // sub) * sub)
    n_blocks = pl.cdiv(rows, block_rows)
    # Rebalance block size so the (possibly partial) last block isn't tiny.
    balanced = pl.cdiv(rows, n_blocks)
    block_rows = max(sub, min(block_rows, pl.cdiv(balanced, sub) * sub))
    n_blocks = pl.cdiv(rows, block_rows)

    x2d = coordinates.reshape(rows, _LANES)          # free bitcast, no copy
    scale = jnp.asarray([scale_py], dtype=jnp.float32)

    cost = pl.CostEstimate(
        flops=total,
        transcendentals=0,
        bytes_accessed=2 * total * itemsize,
    )

    out2d = pl.pallas_call(
        _scale_kernel,
        out_shape=jax.ShapeDtypeStruct((rows, _LANES), dtype),
        grid=(n_blocks,),
        in_specs=[
            pl.BlockSpec(memory_space=pltpu.MemorySpace.SMEM),    # scale
            pl.BlockSpec((block_rows, _LANES), lambda i: (i, 0)),  # coords
        ],
        out_specs=pl.BlockSpec((block_rows, _LANES), lambda i: (i, 0)),
        compiler_params=pltpu.CompilerParams(
            dimension_semantics=("parallel",),
            vmem_limit_bytes=_VMEM_LIMIT_BYTES,
        ),
        cost_estimate=cost,
    )(scale, x2d)

    # Output is contiguous (rows, 128); reshape back is a free bitcast.
    return out2d.reshape(orig_shape)


if __name__ == "__main__":
    key = jax.random.PRNGKey(0)
    k1, k2, k3 = jax.random.split(key, 3)
    sidelength = 0.24

    # 1) Tiny pi-GAN-style batch -> small-input fast path.
    small = jax.random.uniform(
        k1, (2, 8, 3), dtype=jnp.float32,
        minval=-sidelength / 2, maxval=sidelength / 2,
    )
    out_small = jax.block_until_ready(uniform_box_warp(small, sidelength))
    assert out_small.shape == small.shape and out_small.dtype == small.dtype
    assert jnp.allclose(out_small, small * (2.0 / sidelength), atol=1e-6, rtol=1e-6)

    # 2) Ray-marching sized batch -> Pallas kernel path
    #    (total = 2*16384*3 = 98304, multiple of 128, >= 64K elements).
    coords = jax.random.uniform(
        k2, (2, 16384, 3), dtype=jnp.float32,
        minval=-sidelength / 2, maxval=sidelength / 2,
    )
    out = jax.block_until_ready(uniform_box_warp(coords, sidelength))
    ref = coords * (2.0 / sidelength)
    assert out.shape == coords.shape and out.dtype == coords.dtype
    assert jnp.allclose(out, ref, atol=1e-6, rtol=1e-6)

    # 3) bf16 kernel path (exercises the 16-row sublane alignment).
    coords_bf16 = jax.random.uniform(
        k3, (4, 8192, 3), dtype=jnp.float32, minval=-1.0, maxval=1.0
    ).astype(jnp.bfloat16)
    out_bf16 = jax.block_until_ready(uniform_box_warp(coords_bf16, sidelength))
    ref_bf16 = coords_bf16 * jnp.bfloat16(2.0 / sidelength)
    assert out_bf16.shape == coords_bf16.shape and out_bf16.dtype == jnp.bfloat16
    assert jnp.allclose(
        out_bf16.astype(jnp.float32), ref_bf16.astype(jnp.float32),
        atol=1e-2, rtol=1e-2,
    )

    print("KERNEL_OK")
</pallas_src>

<mosaic_0001>
module attributes {stable_mosaic.version = 11 : i64} {
  func.func @_scale_kernel(%arg0: i32, %arg1: memref<1xf32, #tpu.memory_space<smem>>, %arg2: memref<384x128xf32, #tpu.memory_space<vmem>>, %arg3: memref<384x128xf32, #tpu.memory_space<vmem>>) attributes {dimension_semantics = [#tpu.dimension_semantics<parallel>], iteration_bounds = array<i64: 2>, scalar_prefetch = 0 : i64, scratch_operands = 0 : i64, tpu.core_type = #tpu.core_type<tc>, window_params = [{transform_indices = @transform_0, window_bounds = array<i64: 1>}, {transform_indices = @transform_1, window_bounds = array<i64: 384, 128>}, {transform_indices = @transform_2, window_bounds = array<i64: 384, 128>}]} {
    %c0 = arith.constant 0 : index
    %c0_0 = arith.constant 0 : index
    %0 = vector.load %arg2[%c0, %c0_0] : memref<384x128xf32, #tpu.memory_space<vmem>>, vector<384x128xf32>
    %c0_1 = arith.constant 0 : index
    %1 = memref.load %arg1[%c0_1] : memref<1xf32, #tpu.memory_space<smem>>
    %2 = vector.broadcast %1 : f32 to vector<384x128xf32>
    %3 = arith.mulf %0, %2 : vector<384x128xf32>
    %c0_2 = arith.constant 0 : index
    %c0_3 = arith.constant 0 : index
    %4 = vector.load %arg3[%c0_2, %c0_3] : memref<384x128xf32, #tpu.memory_space<vmem>>, vector<384x128xf32>
    tpu.vector_store %arg3[%c0_2, %c0_3], %3 {strides = array<i32>} : memref<384x128xf32, #tpu.memory_space<vmem>>, vector<384x128xf32>,
    return
  }
  func.func @transform_0(%arg0: i32) -> i32 {
    %c0_i32 = arith.constant 0 : i32
    %c0_i32_0 = arith.constant 0 : i32
    return %c0_i32 : i32
  }
  func.func @transform_1(%arg0: i32) -> (i32, i32) {
    %c0_i32 = arith.constant 0 : i32
    %c0_i32_0 = arith.constant 0 : i32
    return %arg0, %c0_i32 : i32, i32
  }
  func.func @transform_2(%arg0: i32) -> (i32, i32) {
    %c0_i32 = arith.constant 0 : i32
    %c0_i32_0 = arith.constant 0 : i32
    return %arg0, %c0_i32 : i32, i32
  }
}

</mosaic_0001>

<bundles_post_ra>
// kernel: tpu_custom_call.1
= control target key start
LH: loop header
LB: loop body
LE: loop exit
PB: predicated region body
PF: predicated region fallthrough
CT: control target
= control target key end

     0   :  { %s852_s0 = inlined_call_operand.<no memory space> [shape: f32[1], index: 0, kind: input, shape index: {}]   ;;  %s853_s1 = inlined_call_operand.hbm [shape: f32[768,128], index: 1, kind: input, shape index: {}]   ;;  %s854_s2 = inlined_call_operand.hbm [shape: f32[768,128], index: 2, kind: output, shape index: {}]  }
   0x1   :  { %7 = sst [smem:[#allocation2]] %s852_s0 }
   0x2   :  { %8 = vsyncpa [#allocation4], 0 }
   0x3   :  { %10 = vsyncpa [#allocation4 + $0x1], 0 }
   0x4   :  { %11 = vsyncpa [#allocation5], 0 }
   0x5   :  { %13 = vsyncpa [#allocation5 + $0x1], 0  ;;  %s584_s11 = smov 0   ;;  %s586_s12 = smov 0  }
   0x6   :  { %s588_s13 = smov 0   ;;  %s590_s14 = smov 0  }
   0x7 LB: > { %s605_s0 = sadd.s32 4294967295, %s560_s14   ;;  %s402_s15 = sadd.s32 4294967294, %s560_s14   ;;  %s560_s14 = sphi %s590_s14, %s862_s14   ;;  %s556_s13 = sphi %s588_s13, %s861_s13   ;;  %s552_s12 = sphi %s586_s12, %s860_s12   ;;  %s548_s11 = sphi %s584_s11, %s859_s11  }
   0x8   : > { %s609_s16 = sadd.s32 1, %s560_s14   ;;  %s47_s17 = sadd.s32 1, %s556_s13 }
   0x9   : > { %s44_s18 = ssub.s32 %s560_s14, %s609_s16  ;;  %p54_p0 = scmp.ne.s32.totalorder %s556_s13, %s552_s12 }
   0xa   : > { %p45_p1 = scmp.eq.s32.totalorder %s44_s18, 0  ;;  %p55_p2 = scmp.eq.s32.totalorder %s560_s14, 0 }
   0xb   : > { %p60_p3 = scmp.ne.s32.totalorder %s552_s12, %s548_s11  ;;  %p61_p4 = scmp.eq.s32.totalorder %s605_s0, 0 }
   0xc   : > { %s621_s19 = scalar_select %p45_p1, %s556_s13, %s47_s17  }
   0xd   : > { %p56_p5 = por %p55_p2, %p54_p0  ;;  %p623_p6 = por %p61_p4, %p60_p3 }
   0xe   : > { %p84_p7 = scmp.eq.s32.totalorder %s605_s0, 1  ;;  %p90_p8 = scmp.eq.s32.totalorder %s402_s15, 1 }
   0xf   : > { %p404_p9 = scmp.ge.s32.totalorder %s560_s14, 2  ;;  %p426_p10 = scmp.lt.s32.totalorder %s560_s14, 2 }
  0x10   : > { %p630_p11 = por %p84_p7, %p54_p0  ;;  %p634_p12 = por %p90_p8, %p60_p3 }
  0x11   : > { %s113_s23 = sand.u32 1, %s556_s13   ;;  %s410_s24 = smul.u32 384, %s560_s14 }
  0x12   : > { %s412_s25 = smul.u32 384, %s113_s23  ;;  %p643_p13 = pnand %p426_p10, %p56_p5 }
  0x13   : > { %s122_s28 = scalar_lea.hbm %s853_s1, %s410_s24  ;;  %s114_s5 = scalar_lea.sflag [#allocation4], %s113_s23 }
  0x14   : > { %s123_s30 = sshll.u32 %s122_s28, 4  ;;  %s117_s3 = scalar_lea.vmem [#allocation3], %s412_s25  ;;  %s124_s30 = int_to_ptr.hbm [resolvable:$true] %s123_s30 }
  0x15   : > { %s125_s4 = sshll.u32 %s117_s3, 4  ;;  %s464_s6 = sshra.s32 %s124_s30, 4  ;;  %s126_s4 = int_to_ptr.vmem [resolvable:$true] %s125_s4  ;;  %s465_s6 = int_to_ptr.hbm [resolvable:$true] %s464_s6 }
  0x16   : > { %s466_s7 = scalar_lea.hbm %s465_s6, 384  ;;  %p468_p1 = pneg %p643_p13 }
  0x17   : > { %p467_p0 = scmp.ne.s32.totalorder %s465_s6, %s466_s7  ;;  %s471_s10 = scalar_lea.hbm %s853_s1, 768 }
  0x18   : > { %p472_p4 = scmp.lt.s32.totalorder %s465_s6, %s853_s1  ;;  %p473_p5 = scmp.lt.s32.totalorder %s471_s10, %s466_s7 }
  0x19   : > { %p469_p2 = pnand %p468_p1, %p467_p0 }
  0x1a   : > { %p474_p7 = por %p473_p5, %p472_p4 }
  0x1b   : > { %p470_p3 = pneg %p469_p2 }
  0x1d   : > { %p475_p8 = pnand %p474_p7, %p470_p3 }
  0x1f   : > { %478 = shalt.err (!%p475_p8)
}
  0x20   : > { %s562_s18 = smov 128   ;;  %s563_s23 = smov 8  }
  0x21   : > { %421 = dma.hbm_to_vmem [thread:$0]  (!%p643_p13), %s124_s30, 6144, %s126_s4, %s114_s5, %s562_s18, %s562_s18, %s563_s23  }
  0x22   : > { %p406_p10 = scmp.ge.s32.totalorder %s560_s14, 1  ;;  %p133_p0 = scmp.lt.s32.totalorder %s560_s14, 3 }
  0x24   : > { %p134_p1 = pnand %p406_p10, %p133_p0 }
  0x25   : > { %s660_s24 = sand.u32 (!%p134_p1), 1, %s552_s12  }
  0x26   : > { %137 = sbr.rel (%p134_p1) target bundleno = 104 (0x68), region = 28  ;;  %s140_s26 = scalar_lea.sflag (!%p134_p1), [#allocation4], %s660_s24 }
  0x27   : > { %s413_s25 = smul.u32 (!%p134_p1), 384, %s660_s24 }
  0x29   : > { %s664_s27 = scalar_lea.vmem (!%p134_p1), [#allocation3], %s413_s25 }
  0x2b   : > { %539 = dma.done.wait (%p623_p6), %s140_s26, 6144  }
  0x2c   : > { %541 = vsyncadd (%p623_p6), %s140_s26, 4294961152  ;;  %s215_s28 = sld [smem:[#allocation2]]  ;;  %v167_v0 = vld [vmem:[%s664_s27] sm:$0xff]  ;;  %v168_v2 = vld [vmem:[%s664_s27 + $0x8] sm:$0xff]  ;;  %s683_s20 = scalar_lea.vmem [#allocation6], %s413_s25 }
  0x2d   : > { %v169_v3 = vld [vmem:[%s664_s27 + $0x10] sm:$0xff]  ;;  %v170_v7 = vld [vmem:[%s664_s27 + $0x18] sm:$0xff]  ;;  %v171_v8 = vld [vmem:[%s664_s27 + $0x20] sm:$0xff]  ;;  %s411_s29 = smul.u32 384, %s605_s0  ;;  %s326_s4 = sshll.u32 %s683_s20, 4  ;;  %s327_s4 = int_to_ptr.vmem [resolvable:$true] %s326_s4 }
  0x2e   : > { %v172_v9 = vld [vmem:[%s664_s27 + $0x28] sm:$0xff]  ;;  %v173_v11 = vld [vmem:[%s664_s27 + $0x30] sm:$0xff]  ;;  %v174_v13 = vld [vmem:[%s664_s27 + $0x38] sm:$0xff]  ;;  %s314_s6 = scalar_lea.sflag [#allocation5], %s660_s24  ;;  %s514_s15 = scalar_lea.hbm %s854_s2, 768 }
  0x2f   : > { %v175_v15 = vld [vmem:[%s664_s27 + $0x40] sm:$0xff]  ;;  %v176_v17 = vld [vmem:[%s664_s27 + $0x48] sm:$0xff]  ;;  %v177_v19 = vld [vmem:[%s664_s27 + $0x50] sm:$0xff]  ;;  %s325_s3 = scalar_lea.hbm %s854_s2, %s411_s29 }
  0x30   : > { %v178_v21 = vld [vmem:[%s664_s27 + $0x58] sm:$0xff]  ;;  %v179_v23 = vld [vmem:[%s664_s27 + $0x60] sm:$0xff]  ;;  %v180_v25 = vld [vmem:[%s664_s27 + $0x68] sm:$0xff]  ;;  %s328_s5 = sshll.u32 %s325_s3, 4  ;;  %s329_s5 = int_to_ptr.hbm [resolvable:$true] %s328_s5 }
  0x31   : > { %v181_v27 = vld [vmem:[%s664_s27 + $0x70] sm:$0xff]  ;;  %v182_v29 = vld [vmem:[%s664_s27 + $0x78] sm:$0xff]  ;;  %v183_v31 = vld [vmem:[%s664_s27 + $0x80] sm:$0xff]  ;;  %s508_s7 = sshra.s32 %s329_s5, 4  ;;  %s509_s7 = int_to_ptr.hbm [resolvable:$true] %s508_s7 }
  0x32   : > { %v671_v1 = vstv %s215_s28  ;;  %v184_v33 = vld [vmem:[%s664_s27 + $0x88] sm:$0xff]  ;;  %v185_v35 = vld [vmem:[%s664_s27 + $0x90] sm:$0xff]  ;;  %v186_v37 = vld [vmem:[%s664_s27 + $0x98] sm:$0xff]  ;;  %s510_s8 = scalar_lea.hbm %s509_s7, 384  ;;  %p515_p3 = scmp.lt.s32.totalorder %s509_s7, %s854_s2 }
  0x33   : > { %v217_v4 = vmul.f32 %v671_v1, %v167_v0  ;;  %v218_v5 = vmul.f32 %v671_v1, %v168_v2  ;;  %v219_v6 = vmul.f32 %v671_v1, %v169_v3  ;;  %v220_v10 = vmul.f32 %v671_v1, %v170_v7  ;;  %v187_v39 = vld [vmem:[%s664_s27 + $0xa0] sm:$0xff]  ;;  %v188_v41 = vld [vmem:[%s664_s27 + $0xa8] sm:$0xff]  ;;  %v189_v43 = vld [vmem:[%s664_s27 + $0xb0] sm:$0xff]  ;;  %p511_p6 = scmp.ne.s32.totalorder %s509_s7, %s510_s8  ;;  %p516_p4 = scmp.lt.s32.totalorder %s514_s15, %s510_s8 }
  0x34   : > { %v221_v12 = vmul.f32 %v671_v1, %v171_v8  ;;  %v222_v14 = vmul.f32 %v671_v1, %v172_v9  ;;  %v223_v16 = vmul.f32 %v671_v1, %v173_v11  ;;  %v224_v18 = vmul.f32 %v671_v1, %v174_v13  ;;  %v190_v45 = vld [vmem:[%s664_s27 + $0xb8] sm:$0xff]  ;;  %v191_v47 = vld [vmem:[%s664_s27 + $0xc0] sm:$0xff]  ;;  %v192_v49 = vld [vmem:[%s664_s27 + $0xc8] sm:$0xff] }
  0x35   : > { %265 = vst [vmem:[%s683_s20] sm:$0xff] %v217_v4  ;;  %v225_v20 = vmul.f32 %v671_v1, %v175_v15  ;;  %v226_v22 = vmul.f32 %v671_v1, %v176_v17  ;;  %v227_v24 = vmul.f32 %v671_v1, %v177_v19  ;;  %v228_v26 = vmul.f32 %v671_v1, %v178_v21  ;;  %v193_v51 = vld [vmem:[%s664_s27 + $0xd0] sm:$0xff]  ;;  %v194_v53 = vld [vmem:[%s664_s27 + $0xd8] sm:$0xff]  ;;  %v195_v55 = vld [vmem:[%s664_s27 + $0xe0] sm:$0xff]  ;;  %p512_p13 = pnand %p511_p6, %p630_p11  ;;  %p517_p5 = por %p516_p4, %p515_p3 }
  0x36   : > { %266 = vst [vmem:[%s683_s20 + $0x8] sm:$0xff] %v218_v5  ;;  %v229_v28 = vmul.f32 %v671_v1, %v179_v23  ;;  %v230_v30 = vmul.f32 %v671_v1, %v180_v25  ;;  %v231_v32 = vmul.f32 %v671_v1, %v181_v27  ;;  %v232_v34 = vmul.f32 %v671_v1, %v182_v29  ;;  %v196_v57 = vld [vmem:[%s664_s27 + $0xe8] sm:$0xff]  ;;  %v197_v59 = vld [vmem:[%s664_s27 + $0xf0] sm:$0xff]  ;;  %v198_v61 = vld [vmem:[%s664_s27 + $0xf8] sm:$0xff] }
  0x37   : > { %267 = vst [vmem:[%s683_s20 + $0x10] sm:$0xff] %v219_v6  ;;  %v233_v36 = vmul.f32 %v671_v1, %v183_v31  ;;  %v234_v38 = vmul.f32 %v671_v1, %v184_v33  ;;  %v235_v40 = vmul.f32 %v671_v1, %v185_v35  ;;  %v236_v42 = vmul.f32 %v671_v1, %v186_v37  ;;  %v199_v63 = vld [vmem:[%s664_s27 + $0x100] sm:$0xff]  ;;  %v200_v2 = vld [vmem:[%s664_s27 + $0x108] sm:$0xff]  ;;  %v201_v4 = vld [vmem:[%s664_s27 + $0x110] sm:$0xff]  ;;  %p513_p2 = pneg %p512_p13 }
  0x38   : > { %268 = vst [vmem:[%s683_s20 + $0x18] sm:$0xff] %v220_v10  ;;  %v237_v44 = vmul.f32 %v671_v1, %v187_v39  ;;  %v238_v46 = vmul.f32 %v671_v1, %v188_v41  ;;  %v239_v48 = vmul.f32 %v671_v1, %v189_v43  ;;  %v240_v50 = vmul.f32 %v671_v1, %v190_v45  ;;  %v202_v6 = vld [vmem:[%s664_s27 + $0x118] sm:$0xff]  ;;  %v203_v8 = vld [vmem:[%s664_s27 + $0x120] sm:$0xff]  ;;  %v204_v10 = vld [vmem:[%s664_s27 + $0x128] sm:$0xff] }
  0x39   : > { %269 = vst [vmem:[%s683_s20 + $0x20] sm:$0xff] %v221_v12  ;;  %v241_v52 = vmul.f32 %v671_v1, %v191_v47  ;;  %v242_v54 = vmul.f32 %v671_v1, %v192_v49  ;;  %v243_v56 = vmul.f32 %v671_v1, %v193_v51  ;;  %v244_v58 = vmul.f32 %v671_v1, %v194_v53  ;;  %v205_v12 = vld [vmem:[%s664_s27 + $0x130] sm:$0xff]  ;;  %p518_p7 = pnand %p517_p5, %p513_p2 }
  0x3a   : > { %270 = vst [vmem:[%s683_s20 + $0x28] sm:$0xff] %v222_v14  ;;  %v245_v60 = vmul.f32 %v671_v1, %v195_v55  ;;  %v246_v62 = vmul.f32 %v671_v1, %v196_v57  ;;  %v247_v0 = vmul.f32 %v671_v1, %v197_v59  ;;  %v248_v3 = vmul.f32 %v671_v1, %v198_v61  ;;  %v206_v14 = vld [vmem:[%s664_s27 + $0x138] sm:$0xff] }
  0x3b   : > { %271 = vst [vmem:[%s683_s20 + $0x30] sm:$0xff] %v223_v16  ;;  %v249_v5 = vmul.f32 %v671_v1, %v199_v63  ;;  %v250_v7 = vmul.f32 %v671_v1, %v200_v2  ;;  %v251_v9 = vmul.f32 %v671_v1, %v201_v4  ;;  %v252_v11 = vmul.f32 %v671_v1, %v202_v6  ;;  %v207_v16 = vld [vmem:[%s664_s27 + $0x140] sm:$0xff] }
  0x3c   : > { %272 = vst [vmem:[%s683_s20 + $0x38] sm:$0xff] %v224_v18  ;;  %v253_v13 = vmul.f32 %v671_v1, %v203_v8  ;;  %v254_v15 = vmul.f32 %v671_v1, %v204_v10  ;;  %v255_v17 = vmul.f32 %v671_v1, %v205_v12  ;;  %v208_v18 = vld [vmem:[%s664_s27 + $0x148] sm:$0xff]  ;;  %v256_v19 = vmul.f32 %v671_v1, %v206_v14 }
  0x3d   : > { %273 = vst [vmem:[%s683_s20 + $0x40] sm:$0xff] %v225_v20  ;;  %v209_v20 = vld [vmem:[%s664_s27 + $0x150] sm:$0xff]  ;;  %v257_v21 = vmul.f32 %v671_v1, %v207_v16  ;;  %v258_v23 = vmul.f32 %v671_v1, %v208_v18 }
  0x3e   : > { %274 = vst [vmem:[%s683_s20 + $0x48] sm:$0xff] %v226_v22  ;;  %v210_v22 = vld [vmem:[%s664_s27 + $0x158] sm:$0xff]  ;;  %v259_v25 = vmul.f32 %v671_v1, %v209_v20 }
  0x3f   : > { %275 = vst [vmem:[%s683_s20 + $0x50] sm:$0xff] %v227_v24  ;;  %v211_v24 = vld [vmem:[%s664_s27 + $0x160] sm:$0xff]  ;;  %v260_v27 = vmul.f32 %v671_v1, %v210_v22 }
  0x40   : > { %276 = vst [vmem:[%s683_s20 + $0x58] sm:$0xff] %v228_v26  ;;  %v212_v26 = vld [vmem:[%s664_s27 + $0x168] sm:$0xff]  ;;  %v261_v29 = vmul.f32 %v671_v1, %v211_v24 }
  0x41   : > { %277 = vst [vmem:[%s683_s20 + $0x60] sm:$0xff] %v229_v28  ;;  %v213_v28 = vld [vmem:[%s664_s27 + $0x170] sm:$0xff]  ;;  %v262_v31 = vmul.f32 %v671_v1, %v212_v26 }
  0x42   : > { %278 = vst [vmem:[%s683_s20 + $0x68] sm:$0xff] %v230_v30  ;;  %v214_v30 = vld [vmem:[%s664_s27 + $0x178] sm:$0xff] }
  0x43   : > { %279 = vst [vmem:[%s683_s20 + $0x70] sm:$0xff] %v231_v32  ;;  %v263_v32 = vmul.f32 %v671_v1, %v213_v28  ;;  %v264_v33 = vmul.f32 %v671_v1, %v214_v30 }
  0x44   : > { %280 = vst [vmem:[%s683_s20 + $0x78] sm:$0xff] %v232_v34 }
  0x45   : > { %281 = vst [vmem:[%s683_s20 + $0x80] sm:$0xff] %v233_v36 }
  0x46   : > { %282 = vst [vmem:[%s683_s20 + $0x88] sm:$0xff] %v234_v38 }
  0x47   : > { %283 = vst [vmem:[%s683_s20 + $0x90] sm:$0xff] %v235_v40 }
  0x48   : > { %284 = vst [vmem:[%s683_s20 + $0x98] sm:$0xff] %v236_v42 }
  0x49   : > { %285 = vst [vmem:[%s683_s20 + $0xa0] sm:$0xff] %v237_v44 }
  0x4a   : > { %286 = vst [vmem:[%s683_s20 + $0xa8] sm:$0xff] %v238_v46 }
  0x4b   : > { %287 = vst [vmem:[%s683_s20 + $0xb0] sm:$0xff] %v239_v48 }
  0x4c   : > { %288 = vst [vmem:[%s683_s20 + $0xb8] sm:$0xff] %v240_v50 }
  0x4d   : > { %289 = vst [vmem:[%s683_s20 + $0xc0] sm:$0xff] %v241_v52 }
  0x4e   : > { %290 = vst [vmem:[%s683_s20 + $0xc8] sm:$0xff] %v242_v54 }
  0x4f   : > { %291 = vst [vmem:[%s683_s20 + $0xd0] sm:$0xff] %v243_v56 }
  0x50   : > { %292 = vst [vmem:[%s683_s20 + $0xd8] sm:$0xff] %v244_v58 }
  0x51   : > { %293 = vst [vmem:[%s683_s20 + $0xe0] sm:$0xff] %v245_v60 }
  0x52   : > { %294 = vst [vmem:[%s683_s20 + $0xe8] sm:$0xff] %v246_v62 }
  0x53   : > { %295 = vst [vmem:[%s683_s20 + $0xf0] sm:$0xff] %v247_v0 }
  0x54   : > { %296 = vst [vmem:[%s683_s20 + $0xf8] sm:$0xff] %v248_v3 }
  0x55   : > { %297 = vst [vmem:[%s683_s20 + $0x100] sm:$0xff] %v249_v5 }
  0x56   : > { %298 = vst [vmem:[%s683_s20 + $0x108] sm:$0xff] %v250_v7 }
  0x57   : > { %299 = vst [vmem:[%s683_s20 + $0x110] sm:$0xff] %v251_v9 }
  0x58   : > { %300 = vst [vmem:[%s683_s20 + $0x118] sm:$0xff] %v252_v11 }
  0x59   : > { %301 = vst [vmem:[%s683_s20 + $0x120] sm:$0xff] %v253_v13 }
  0x5a   : > { %302 = vst [vmem:[%s683_s20 + $0x128] sm:$0xff] %v254_v15 }
  0x5b   : > { %303 = vst [vmem:[%s683_s20 + $0x130] sm:$0xff] %v255_v17 }
  0x5c   : > { %304 = vst [vmem:[%s683_s20 + $0x138] sm:$0xff] %v256_v19 }
  0x5d   : > { %305 = vst [vmem:[%s683_s20 + $0x140] sm:$0xff] %v257_v21 }
  0x5e   : > { %306 = vst [vmem:[%s683_s20 + $0x148] sm:$0xff] %v258_v23 }
  0x5f   : > { %307 = vst [vmem:[%s683_s20 + $0x150] sm:$0xff] %v259_v25 }
  0x60   : > { %308 = vst [vmem:[%s683_s20 + $0x158] sm:$0xff] %v260_v27 }
  0x61   : > { %309 = vst [vmem:[%s683_s20 + $0x160] sm:$0xff] %v261_v29 }
  0x62   : > { %310 = vst [vmem:[%s683_s20 + $0x168] sm:$0xff] %v262_v31 }
  0x63   : > { %311 = vst [vmem:[%s683_s20 + $0x170] sm:$0xff] %v263_v32 }
  0x64   : > { %312 = vst [vmem:[%s683_s20 + $0x178] sm:$0xff] %v264_v33 }
  0x65   : > { %521 = shalt.err (!%p518_p7)
}
  0x66   : > { %s564_s23 = smov 128   ;;  %s565_s24 = smov 8  }
  0x67   : > { %416 = dma.vmem_to_hbm [thread:$0]  (%p630_p11), %s327_s4, 6144, %s329_s5, %s314_s6, %s564_s23, %s564_s23, %s565_s24  }
  0x68 PF: > { %s343_s25 = sand.u32 1, %s548_s11   ;;  %p423_p8 = pnand %p404_p9, %p634_p12 }
  0x69   : > { %s344_s26 = scalar_lea.sflag [#allocation5], %s343_s25 }
  0x6a   : > { %p424_p10 = pneg %p423_p8 }
  0x6c   : > { %543 = dma.done.wait (%p424_p10), %s344_s26, 6144  }
  0x6d   : > { %545 = vsyncadd (%p424_p10), %s344_s26, 4294961152  ;;  %p16_p0 = scmp.ge.s32.totalorder %s609_s16, 4   ;;  %s859_s11 = smov %s552_s12 }
  0x6e   : > { %s860_s12 = smov %s556_s13  ;;  %s861_s13 = smov %s621_s19 }
  0x6f   : > { %s862_s14 = smov %s609_s16  ;;  %18 = sbr.rel (!%p16_p0) target bundleno = 7 (0x7), region = 73 }
  0x74   :  { %350 = vsyncpa [#allocation4], 1 }
  0x75   :  { %352 = vsyncpa [#allocation4 + $0x1], 1 }
  0x76   :  { %353 = vsyncpa [#allocation5], 1 }
  0x77   :  { %355 = vsyncpa [#allocation5 + $0x1], 1 }

</bundles_post_ra>
